<compile_context>
chip_gen: v6e
topology: v6e:2x2x1
jax: 0.10.0
libtpu: 0.0.40
codegen_flags: <defaults>
</compile_context>

<pallas_src>
import functools
import math

import jax
import jax.numpy as jnp
from jax.experimental import pallas as pl
from jax.experimental.pallas import tpu as pltpu

LANES = 128
SUBLANES = 8


def _tensorcores_per_chip():
    """2 TensorCores per chip on v7x; earlier generations expose 1 TC/device."""
    try:
        kind = (jax.devices()[0].device_kind or "").lower()
    except Exception:
        return 1
    return 2 if "v7" in kind else 1


def _focal_kernel(p_ref, l_ref, out_ref, *, alpha, gamma, block_rows, slab_rows,
                  nb_per_core, n_valid, binary_labels, needs_mask):
    c = pl.program_id(0)          # TensorCore split (size 1 except on v7x)
    j = pl.program_id(1)          # row-block index within this core (reduction)

    @pl.when(j == 0)
    def _init():
        out_ref[...] = jnp.zeros_like(out_ref)

    blk = c * nb_per_core + j                 # intended (unclamped) block index
    n_slabs = block_rows // slab_rows
    slab_elems = slab_rows * LANES
    eps = 1e-07

    def pow_gamma(x):
        if gamma == 0.5:
            return jnp.sqrt(x)                # EUP; avoids exp(log()) expansion
        if gamma == 1.0:
            return x
        if gamma == 2.0:
            return x * x
        if gamma == 0.0:
            return jnp.ones_like(x)
        return jnp.power(x, jnp.float32(gamma))

    if binary_labels:
        # Exact rewrite of the reference for labels in {0,1}: 2 EUP ops/elem.
        #   q = lab*p + (1-lab)*(1-p) = 1 - (p+lab) + 2*lab*p
        #   w = alpha*lab + (1-alpha)*(1-lab);  loss = -w*(1-q)^g*log(q+eps)
        def slab_loss(p, lab):
            lp = lab * p
            s1 = p + lab
            s2 = lp + lp
            q = (1.0 - s1) + s2
            one_minus_q = s1 - s2
            w_neg = (alpha - 1.0) + (1.0 - 2.0 * alpha) * lab      # = -w
            return w_neg * pow_gamma(one_minus_q) * jnp.log(q + eps)
    else:
        # Exact general-label formula (matches the PyTorch module verbatim).
        def slab_loss(p, lab):
            one_m_p = 1.0 - p
            l1 = (-alpha) * pow_gamma(one_m_p) * jnp.log(p + eps) * lab
            l0 = (alpha - 1.0) * pow_gamma(p) * jnp.log(one_m_p + eps) * (1.0 - lab)
            return l0 + l1

    def do_slab(s, masked):
        r = pl.multiple_of(s * slab_rows, slab_rows)
        p = p_ref[pl.ds(r, slab_rows), :].astype(jnp.float32)
        lab = l_ref[pl.ds(r, slab_rows), :].astype(jnp.float32)
        loss = slab_loss(p, lab)
        if masked:
            # Flat-element validity: zeroes host padding, ragged-DMA garbage
            # rows and duplicated slots.  Masking the LOSS keeps the mean exact
            # for every gamma and stops NaN/Inf from garbage data.
            row = blk * block_rows + r + jax.lax.broadcasted_iota(jnp.int32, loss.shape, 0)
            lane = jax.lax.broadcasted_iota(jnp.int32, loss.shape, 1)
            loss = jnp.where(row * LANES + lane < n_valid, loss, 0.0)
        # (slab,128) -> (slab/8, 8, 128): summing the leading axis is plain VPU
        # adds into the resident (8,128) output block; the single cross-lane /
        # cross-sublane reduce is deferred to the wrapper.
        out_ref[...] += loss.reshape(slab_rows // SUBLANES, SUBLANES, LANES).sum(axis=0)[None]

    def unmasked_body(s, carry):
        do_slab(s, masked=False)
        return carry

    if not needs_mask:
        jax.lax.fori_loop(0, n_slabs, unmasked_body, 0)
    else:
        # Per-block gating: interior blocks run the mask-free loop over every
        # slab; only the slab straddling n_valid pays iota/compare/select, and
        # slabs fully past n_valid (ragged tail / duplicated slot) are skipped.
        rem = n_valid - blk * (block_rows * LANES)      # valid elems in this block
        n_full = jnp.clip(rem // slab_elems, 0, n_slabs)
        has_partial = jnp.logical_and(n_full < n_slabs, rem > n_full * slab_elems)

        jax.lax.fori_loop(0, n_full, unmasked_body, 0)

        @pl.when(has_partial)
        def _tail():
            do_slab(n_full, masked=True)


def focal_loss(preds, labels, alpha=0.8125, gamma=0.5, *, block_rows=4096,
               slab_rows=64, binary_labels=True):
    """Mean focal loss (forward of the PyTorch Focal_Loss module).

    binary_labels=True (the standard focal-loss setting) assumes labels are in
    {0,1} and uses an exact 2-transcendental rewrite; pass binary_labels=False
    for the exact general-label formula.  f32/bf16 inputs are accepted without
    any host-side upcast."""
    assert preds.shape == labels.shape, (preds.shape, labels.shape)
    n_valid = math.prod(preds.shape) if preds.shape else 1
    assert n_valid > 0

    p_flat = jnp.reshape(preds, (-1,))
    l_flat = jnp.reshape(labels, (-1,))

    # Sublane packing factor of the narrower input dtype (8 f32 / 16 bf16 / 32 i8).
    def _pack(x):
        return max(SUBLANES, 32 // max(1, jnp.dtype(x.dtype).itemsize))
    pack = max(_pack(preds), _pack(labels))

    slab_rows = max(pack, (int(slab_rows) // pack) * pack)
    blk_rows = max(slab_rows, (int(block_rows) // slab_rows) * slab_rows)

    rows_exact = pl.cdiv(n_valid, LANES)
    if rows_exact >= blk_rows:
        # Large input: pad only when numel % 128 != 0 (<= 127 elements copied).
        n_rows = rows_exact
        block_rows_f = blk_rows
        slab_f = slab_rows
    else:
        # Small input: one whole-array block; round rows to the packing factor.
        n_rows = pl.cdiv(rows_exact, pack) * pack
        block_rows_f = n_rows
        slab_f = math.gcd(int(n_rows), slab_rows)

    pad = n_rows * LANES - n_valid
    if pad:
        p_flat = jnp.pad(p_flat, (0, pad))
        l_flat = jnp.pad(l_flat, (0, pad))
    p2 = jnp.reshape(p_flat, (n_rows, LANES))
    l2 = jnp.reshape(l_flat, (n_rows, LANES))

    n_blocks = pl.cdiv(n_rows, block_rows_f)
    num_cores = max(1, min(_tensorcores_per_chip(), n_blocks))
    nb_per_core = pl.cdiv(n_blocks, num_cores)
    needs_mask = (num_cores * nb_per_core * block_rows_f * LANES) != n_valid

    if num_cores * nb_per_core == n_blocks:
        def in_map(c, j):
            return (c * nb_per_core + j, 0)
    else:
        # Overhanging slot of the dual-TC split: clamp the DMA onto the last
        # block; its compute is skipped in-kernel (rem <= 0).
        last = n_blocks - 1

        def in_map(c, j):
            return (jnp.minimum(c * nb_per_core + j, last), 0)

    # Only v7x has 2 TensorCores per chip; CORE_PARALLEL actually shards the
    # leading axis across them (plain "parallel" has near-zero codegen impact).
    core_sem = getattr(pltpu, "CORE_PARALLEL", "parallel") if num_cores > 1 else "arbitrary"

    kernel = functools.partial(
        _focal_kernel,
        alpha=float(alpha), gamma=float(gamma),
        block_rows=int(block_rows_f), slab_rows=int(slab_f),
        nb_per_core=int(nb_per_core), n_valid=int(n_valid),
        binary_labels=bool(binary_labels), needs_mask=bool(needs_mask))

    partials = pl.pallas_call(
        kernel,
        out_shape=jax.ShapeDtypeStruct((num_cores, SUBLANES, LANES), jnp.float32),
        grid_spec=pltpu.PrefetchScalarGridSpec(
            num_scalar_prefetch=0,
            grid=(num_cores, nb_per_core),
            in_specs=[
                pl.BlockSpec((block_rows_f, LANES), in_map),
                pl.BlockSpec((block_rows_f, LANES), in_map),
            ],
            out_specs=pl.BlockSpec((1, SUBLANES, LANES), lambda c, j: (c, 0, 0)),
        ),
        compiler_params=pltpu.CompilerParams(
            dimension_semantics=(core_sem, "arbitrary")),
    )(p2, l2)

    # One tiny final cross-lane/sublane reduce + mean normalization (XLA).
    return jnp.sum(partials) * jnp.float32(1.0 / n_valid)


def focal_loss_ref(preds, labels, alpha=0.8125, gamma=0.5):
    eps = 1e-07
    p = preds.astype(jnp.float32)
    lab = labels.astype(jnp.float32)
    loss_1 = -alpha * jnp.power(1.0 - p, gamma) * jnp.log(p + eps) * lab
    loss_0 = -(1.0 - alpha) * jnp.power(p, gamma) * jnp.log(1.0 - p + eps) * (1.0 - lab)
    return jnp.mean(loss_0 + loss_1)


if __name__ == "__main__":
    key = jax.random.PRNGKey(0)
    k1, k2, k3, k4 = jax.random.split(key, 4)

    # Case 1: NCHW f32, binary labels, exact single-block fit (mask-free path).
    shape1 = (2, 4, 16, 16)
    p1 = jax.nn.sigmoid(jax.random.normal(k1, shape1, dtype=jnp.float32))
    y1 = (jax.random.uniform(k2, shape1) > 0.5).astype(jnp.float32)
    o1 = jax.block_until_ready(focal_loss(p1, y1))
    r1 = focal_loss_ref(p1, y1)
    assert jnp.allclose(o1, r1, rtol=2e-5, atol=1e-6), (o1, r1)

    # Case 2: multi-block grid with a ragged last block -> exercises the
    # dynamic slab loop, the partial-slab mask and partial last-block DMA.
    shape2 = (2, 3, 50, 50)
    p2 = jax.nn.sigmoid(jax.random.normal(k3, shape2, dtype=jnp.float32))
    y2 = (jax.random.uniform(k4, shape2) > 0.5).astype(jnp.float32)
    o2 = jax.block_until_ready(focal_loss(p2, y2, block_rows=64, slab_rows=16))
    r2 = focal_loss_ref(p2, y2)
    assert jnp.allclose(o2, r2, rtol=2e-5, atol=1e-6), (o2, r2)

    # Case 3: numel not a multiple of 128 (tiny lane pad, fully masked) +
    # non-binary soft labels via the exact general-label path.
    shape3 = (3, 5, 7, 11)
    p3 = jax.nn.sigmoid(jax.random.normal(k1, shape3, dtype=jnp.float32))
    y3 = jax.random.uniform(k2, shape3, dtype=jnp.float32)
    o3 = jax.block_until_ready(focal_loss(p3, y3, binary_labels=False))
    r3 = focal_loss_ref(p3, y3)
    assert jnp.allclose(o3, r3, rtol=2e-5, atol=1e-6), (o3, r3)

    # Case 4: bf16 inputs fed straight to the kernel (no host upcast).
    p4 = p1.astype(jnp.bfloat16)
    y4 = y1.astype(jnp.bfloat16)
    o4 = jax.block_until_ready(focal_loss(p4, y4))
    r4 = focal_loss_ref(p4, y4)
    assert jnp.allclose(o4, r4, rtol=2e-5, atol=1e-6), (o4, r4)

    print("KERNEL_OK")
</pallas_src>

<mosaic_0001>
module attributes {stable_mosaic.version = 11 : i64} {
  func.func @_focal_kernel(%arg0: i32, %arg1: i32, %arg2: memref<16x128xf32, #tpu.memory_space<vmem>>, %arg3: memref<16x128xf32, #tpu.memory_space<vmem>>, %arg4: memref<1x8x128xf32, #tpu.memory_space<vmem>>) attributes {dimension_semantics = [#tpu.dimension_semantics<arbitrary>, #tpu.dimension_semantics<arbitrary>], iteration_bounds = array<i64: 1, 1>, scalar_prefetch = 0 : i64, scratch_operands = 0 : i64, tpu.core_type = #tpu.core_type<tc>, window_params = [{transform_indices = @transform_0, window_bounds = array<i64: 16, 128>}, {transform_indices = @transform_1, window_bounds = array<i64: 16, 128>}, {transform_indices = @transform_2, window_bounds = array<i64: 1, 8, 128>}]} {
    %c0_i32 = arith.constant 0 : i32
    %0 = arith.cmpi eq, %arg1, %c0_i32 : i32
    %1 = arith.extui %0 : i1 to i32
    %c0_i32_0 = arith.constant 0 : i32
    %2 = arith.cmpi ne, %1, %c0_i32_0 : i32
    scf.if %2 {
      %cst_13 = arith.constant 0.000000e+00 : f32
      %32 = vector.broadcast %cst_13 : f32 to vector<1x8x128xf32>
      %c0_14 = arith.constant 0 : index
      %c0_15 = arith.constant 0 : index
      %c0_16 = arith.constant 0 : index
      %33 = vector.load %arg4[%c0_14, %c0_15, %c0_16] : memref<1x8x128xf32, #tpu.memory_space<vmem>>, vector<1x8x128xf32>
      tpu.vector_store %arg4[%c0_14, %c0_15, %c0_16], %32 {strides = array<i32>} : memref<1x8x128xf32, #tpu.memory_space<vmem>>, vector<1x8x128xf32>,
    } else {
    }
    %c0_i32_1 = arith.constant 0 : i32
    %c16_i32 = arith.constant 16 : i32
    %3 = arith.muli %c0_i32_1, %c16_i32 : i32
    %4 = tpu.assume_multiple %3, 16 : i32
    %5 = arith.index_cast %4 : i32 to index
    %c0 = arith.constant 0 : index
    %6 = vector.load %arg2[%5, %c0] : memref<16x128xf32, #tpu.memory_space<vmem>>, vector<16x128xf32>
    %7 = arith.index_cast %4 : i32 to index
    %c0_2 = arith.constant 0 : index
    %8 = vector.load %arg3[%7, %c0_2] : memref<16x128xf32, #tpu.memory_space<vmem>>, vector<16x128xf32>
    %9 = arith.mulf %8, %6 : vector<16x128xf32>
    %10 = arith.addf %6, %8 : vector<16x128xf32>
    %11 = arith.addf %9, %9 : vector<16x128xf32>
    %cst = arith.constant 1.000000e+00 : f32
    %12 = vector.broadcast %cst : f32 to vector<16x128xf32>
    %13 = arith.subf %12, %10 : vector<16x128xf32>
    %14 = arith.addf %13, %11 : vector<16x128xf32>
    %15 = arith.subf %10, %11 : vector<16x128xf32>
    %cst_3 = arith.constant -6.250000e-01 : f32
    %16 = vector.broadcast %cst_3 : f32 to vector<16x128xf32>
    %17 = arith.mulf %16, %8 : vector<16x128xf32>
    %cst_4 = arith.constant -1.875000e-01 : f32
    %18 = vector.broadcast %cst_4 : f32 to vector<16x128xf32>
    %19 = arith.addf %18, %17 : vector<16x128xf32>
    %20 = math.sqrt %15 : vector<16x128xf32>
    %21 = arith.mulf %19, %20 : vector<16x128xf32>
    %cst_5 = arith.constant 1.000000e-07 : f32
    %22 = vector.broadcast %cst_5 : f32 to vector<16x128xf32>
    %23 = arith.addf %14, %22 : vector<16x128xf32>
    %24 = math.log %23 : vector<16x128xf32>
    %25 = arith.mulf %21, %24 : vector<16x128xf32>
    %c0_6 = arith.constant 0 : index
    %c0_7 = arith.constant 0 : index
    %c0_8 = arith.constant 0 : index
    %26 = vector.load %arg4[%c0_6, %c0_7, %c0_8] : memref<1x8x128xf32, #tpu.memory_space<vmem>>, vector<1x8x128xf32>
    %27 = vector.shape_cast %25 : vector<16x128xf32> to vector<2x8x128xf32>
    %cst_9 = arith.constant dense<0.000000e+00> : vector<8x128xf32>
    %28 = vector.multi_reduction <add>, %27, %cst_9 [0] : vector<2x8x128xf32> to vector<8x128xf32>
    %29 = vector.shape_cast %28 : vector<8x128xf32> to vector<1x8x128xf32>
    %30 = arith.addf %26, %29 : vector<1x8x128xf32>
    %c0_10 = arith.constant 0 : index
    %c0_11 = arith.constant 0 : index
    %c0_12 = arith.constant 0 : index
    %31 = vector.load %arg4[%c0_10, %c0_11, %c0_12] : memref<1x8x128xf32, #tpu.memory_space<vmem>>, vector<1x8x128xf32>
    tpu.vector_store %arg4[%c0_10, %c0_11, %c0_12], %30 {strides = array<i32>} : memref<1x8x128xf32, #tpu.memory_space<vmem>>, vector<1x8x128xf32>,
    %c1_i32 = arith.constant 1 : i32
    return
  }
  func.func @transform_0(%arg0: i32, %arg1: i32) -> (i32, i32) {
    %c1_i32 = arith.constant 1 : i32
    %0 = arith.muli %arg0, %c1_i32 : i32
    %1 = arith.addi %0, %arg1 : i32
    %c0_i32 = arith.constant 0 : i32
    %c0_i32_0 = arith.constant 0 : i32
    return %1, %c0_i32 : i32, i32
  }
  func.func @transform_1(%arg0: i32, %arg1: i32) -> (i32, i32) {
    %c1_i32 = arith.constant 1 : i32
    %0 = arith.muli %arg0, %c1_i32 : i32
    %1 = arith.addi %0, %arg1 : i32
    %c0_i32 = arith.constant 0 : i32
    %c0_i32_0 = arith.constant 0 : i32
    return %1, %c0_i32 : i32, i32
  }
  func.func @transform_2(%arg0: i32, %arg1: i32) -> (i32, i32, i32) {
    %c0_i32 = arith.constant 0 : i32
    %c0_i32_0 = arith.constant 0 : i32
    %c0_i32_1 = arith.constant 0 : i32
    return %arg0, %c0_i32, %c0_i32_0 : i32, i32, i32
  }
}

</mosaic_0001>

<bundles_post_ra>
// kernel: tpu_custom_call.1
= control target key start
LH: loop header
LB: loop body
LE: loop exit
PB: predicated region body
PF: predicated region fallthrough
CT: control target
= control target key end

     0   :  { %7 = vsyncpa [#allocation3], 0  ;;  %s230_s0 = inlined_call_operand.hbm [shape: f32[16,128], index: 0, kind: input, shape index: {}]   ;;  %s231_s1 = inlined_call_operand.hbm [shape: f32[16,128], index: 1, kind: input, shape index: {}]   ;;  %s232_s2 = inlined_call_operand.hbm [shape: f32[1,8,128], index: 2, kind: output, shape index: {}]  }
   0x1   :  { %8 = vsyncpa [#allocation6], 0 }
   0x2   :  { %9 = vsyncpa [#allocation4], 0  ;;  %s201_s9 = smov [#allocation2]  }
   0x3   :  { %s19_s10 = sshll.u32 %s201_s9, 4  ;;  %s20_s10 = int_to_ptr.vmem [resolvable:$true] %s19_s10 }
   0x4   :  { %s143_s11 = scalar_lea.vmem %s20_s10, 256  ;;  %p148_p1 = scmp.lt.s32.totalorder %s20_s10, %s20_s10 }
   0x5   :  { %p144_p0 = scmp.ne.s32.totalorder %s20_s10, %s143_s11  ;;  %p149_p2 = scmp.lt.s32.totalorder %s143_s11, %s143_s11 }
   0x7   :  { %p150_p3 = por %p149_p2, %p148_p1 }
   0x9   :  { %p151_p4 = pnand %p150_p3, %p144_p0 }
   0xb   :  { %154 = shalt.err (!%p151_p4)
}
   0xc   :  { %s202_s12 = smov 128   ;;  %s203_s13 = smov 8  }
   0xd   :  { %25 = dma.hbm_to_vmem [thread:$0]  %s230_s0, 256, %s20_s10, [#allocation3], %s202_s12, %s202_s12, %s203_s13  }
   0xe   :  { %s204_s16 = smov [#allocation5]  }
   0xf   :  { %s35_s17 = sshll.u32 %s204_s16, 4  ;;  %s36_s17 = int_to_ptr.vmem [resolvable:$true] %s35_s17 }
  0x10   :  { %s163_s18 = scalar_lea.vmem %s36_s17, 256  ;;  %p168_p6 = scmp.lt.s32.totalorder %s36_s17, %s36_s17 }
  0x11   :  { %p164_p5 = scmp.ne.s32.totalorder %s36_s17, %s163_s18  ;;  %p169_p7 = scmp.lt.s32.totalorder %s163_s18, %s163_s18 }
  0x13   :  { %p170_p8 = por %p169_p7, %p168_p6 }
  0x15   :  { %p171_p9 = pnand %p170_p8, %p164_p5 }
  0x17   :  { %174 = shalt.err (!%p171_p9)
}
  0x18   :  { %41 = dma.hbm_to_vmem [thread:$0]  %s231_s1, 256, %s36_s17, [#allocation6], %s202_s12, %s202_s12, %s203_s13  }
  0x19   :  { %195 = dma.done.wait [#allocation3], 256  }
  0x1a   :  { %196 = vsyncadd [#allocation3], 4294967040 }
  0x1b   :  { %197 = dma.done.wait [#allocation6], 256  }
  0x1c   :  { %198 = vsyncadd [#allocation6], 4294967040  ;;  %v57_v0 = vld [vmem:[#allocation2] sm:$0xff]  ;;  %v58_v1 = vld [vmem:[#allocation2 + $0x8] sm:$0xff]  ;;  %s205_s0 = smov [#allocation7]  }
  0x1d   :  { %v59_v2 = vld [vmem:[#allocation5] sm:$0xff]  ;;  %v60_v3 = vld [vmem:[#allocation5 + $0x8] sm:$0xff]  ;;  %s111_s1 = sshll.u32 %s205_s0, 4  ;;  %s112_s1 = int_to_ptr.vmem [resolvable:$true] %s111_s1 }
  0x1e   :  { %v61_v4 = vmul.f32 %v59_v2, %v57_v0  ;;  %v63_v5 = vadd.f32 %v59_v2, %v57_v0  ;;  %v62_v6 = vmul.f32 %v60_v3, %v58_v1  ;;  %v64_v7 = vadd.f32 %v60_v3, %v58_v1  ;;  %s175_s21 = scalar_lea.vmem %s112_s1, 128  ;;  %p180_p11 = scmp.lt.s32.totalorder %s112_s1, %s112_s1 }
  0x1f   :  { %v73_v18 = vmul.f32 -0.625, %v59_v2  ;;  %v74_v19 = vmul.f32 -0.625, %v60_v3  ;;  %p176_p10 = scmp.ne.s32.totalorder %s112_s1, %s175_s21  ;;  %p181_p12 = scmp.lt.s32.totalorder %s175_s21, %s175_s21 }
  0x20   :  { %v65_v8 = vadd.f32 %v61_v4, %v61_v4  ;;  %v67_v9 = vsub.f32 1.0, %v63_v5  ;;  %v66_v10 = vadd.f32 %v62_v6, %v62_v6  ;;  %v68_v11 = vsub.f32 1.0, %v64_v7 }
  0x21   :  { %v75_v21 = vadd.f32 -0.1875, %v73_v18  ;;  %v76_v26 = vadd.f32 -0.1875, %v74_v19  ;;  %p182_p13 = por %p181_p12, %p180_p11 }
  0x22   :  { %v69_v12 = vadd.f32 %v67_v9, %v65_v8  ;;  %v71_v13 = vsub.f32 %v63_v5, %v65_v8  ;;  %v70_v14 = vadd.f32 %v68_v11, %v66_v10  ;;  %v72_v15 = vsub.f32 %v64_v7, %v66_v10 }
  0x23   :  { %p183_p0 = pnand %p182_p13, %p176_p10 }
  0x24   :  { %127 = vrsqrt.f32 %v71_v13  ;;  %v93_v16 = vadd.f32 1e-07, %v69_v12  ;;  %v94_v17 = vadd.f32 1e-07, %v70_v14  ;;  %vm79_vm0 = vcmp.eq.f32.partialorder %v71_v13, inf }
  0x25   :  { %129 = vrsqrt.f32 %v72_v15  ;;  %v82_v22 = vand.u32 2147483648, %v71_v13  ;;  %vm81_vm1 = vcmp.eq.f32.partialorder %v71_v13, 0.0  ;;  %vm86_vm2 = vcmp.eq.f32.partialorder %v72_v15, inf }
  0x26   :  { %131 = vlog2.f32 %v93_v16  ;;  %v89_v25 = vand.u32 2147483648, %v72_v15  ;;  %vm88_vm3 = vcmp.eq.f32.partialorder %v72_v15, 0.0 }
  0x27   :  { %133 = vlog2.f32 %v94_v17 }
  0x31   :  { %v128_v20 = vpop.eup %127 }
  0x32   :  { %v130_v23 = vpop.eup %129  ;;  %v78_v24 = vmul.f32 %v128_v20, %v71_v13 }
  0x33   :  { %v85_v27 = vmul.f32 %v130_v23, %v72_v15  ;;  %v132_v29 = vpop.eup %131 }
  0x34   :  { %v80_v28 = vsel %vm79_vm0, %v71_v13, %v78_v24  ;;  %v134_v32 = vpop.eup %133  ;;  %v96_v35 = vmul.f32 0.6931472, %v132_v29 }
  0x35   :  { %v83_v30 = vsel %vm81_vm1, %v82_v22, %v80_v28  ;;  %v87_v31 = vsel %vm86_vm2, %v72_v15, %v85_v27  ;;  %v98_v37 = vmul.f32 0.6931472, %v134_v32 }
  0x36   :  { %v90_v33 = vsel %vm88_vm3, %v89_v25, %v87_v31  ;;  %v91_v34 = vmul.f32 %v83_v30, %v75_v21 }
  0x37   :  { %v92_v36 = vmul.f32 %v90_v33, %v76_v26 }
  0x38   :  { %v99_v38 = vmul.f32 %v96_v35, %v91_v34 }
  0x39   :  { %v100_v39 = vmul.f32 %v98_v37, %v92_v36 }
  0x3b   :  { %v102_v40 = vadd.f32 %v100_v39, %v99_v38 }
  0x3d   :  { %104 = vst [vmem:[#allocation7] sm:$0xff] %v102_v40 }
  0x3e   :  { %186 = shalt.err (!%p183_p0)
}
  0x3f   :  { %114 = dma.vmem_to_hbm [thread:$0]  %s112_s1, 128, %s232_s2, [#allocation4]  }
  0x40   :  { %199 = dma.done.wait [#allocation4], 128  }
  0x41   :  { %200 = vsyncadd [#allocation4], 4294967168 }
  0x42   :  { %118 = vsyncpa [#allocation3], 1 }
  0x43   :  { %119 = vsyncpa [#allocation6], 1 }
  0x44   :  { %120 = vsyncpa [#allocation4], 1 }

</bundles_post_ra>
